<compile_context>
chip_gen: v7x
topology: tpu7x:2x2x1
jax: 0.10.0
libtpu: 0.0.40
codegen_flags: <defaults>
</compile_context>

<pallas_src>
import functools

import jax
import jax.numpy as jnp
from jax import lax
from jax.experimental import pallas as pl
from jax.experimental.pallas import tpu as pltpu


def _cross_attn_kernel(x_ref, ctx_ref, wqkv_ref, wo_ref, o_ref, *,
                       heads, dim_head, n_seq, m_seq, batches):
    # x_ref:    (bps*N, D)            f32
    # ctx_ref:  (bps*M, Dc)           f32   (Dc == D, guarded host-side)
    # wqkv_ref: (D, H*dh + 2*dh)      bf16  [gamma*scale*Wq | Wkv] column-stacked
    # wo_ref:   (H*dh, D)             bf16
    # o_ref:    (bps*N, D)            f32
    inner = heads * dim_head
    x = x_ref[...]                     # (bps*N, D)  f32
    ctx = ctx_ref[...]                 # (bps*M, Dc) f32

    # LayerNorm over last dim (beta is a zero buffer; eps matches F.layer_norm).
    # gamma is folded into the q weight host-side (normalized x only feeds
    # to_q here).  Variance via E[x^2] - mean^2 -> the two XLU reductions are
    # independent.
    mean = jnp.mean(x, axis=-1, keepdims=True)
    ex2 = jnp.mean(x * x, axis=-1, keepdims=True)
    var = ex2 - mean * mean
    xn = ((x - mean) * lax.rsqrt(var + 1e-5)).astype(jnp.bfloat16)

    # Fused q/kv projection: one MXU matmul over the row-stacked [xn ; ctx]
    # slab against the column-stacked weight.  Off-diagonal blocks of the
    # result are discarded (free — the MXU is latency-bound at these sizes).
    xin = jnp.concatenate([xn, ctx.astype(jnp.bfloat16)], axis=0)
    res = jnp.dot(xin, wqkv_ref[...], preferred_element_type=jnp.float32)
    nq = batches * n_seq
    q = res[:nq, :inner]               # (bps*N, H*dh) f32, scale already folded
    kv = res[nq:, inner:]              # (bps*M, 2*dh) f32

    out_rows = []
    for b in range(batches):           # static loop; attention is per-batch
        # Pack all heads of this batch along rows so k/v (shared across heads)
        # see one (H*N, dh) attention pass instead of H tiny ones.
        # TODO(synk): evaluate pltpu.einshape('n(hd)->(hn)d') for this repack
        # (and its inverse below) once its grouped-equation lowering is
        # verified; slice+concat kept here to guarantee a clean compile.
        q_sb = jnp.concatenate(
            [q[b * n_seq:(b + 1) * n_seq, h * dim_head:(h + 1) * dim_head]
             for h in range(heads)], axis=0).astype(jnp.bfloat16)   # (H*N, dh)
        k_b = kv[b * m_seq:(b + 1) * m_seq, :dim_head].astype(jnp.bfloat16)
        v_b = kv[b * m_seq:(b + 1) * m_seq, dim_head:].astype(jnp.bfloat16)

        # sim = q_sb @ k_b^T without materializing a transpose.
        sim = lax.dot_general(q_sb, k_b, (((1,), (1,)), ((), ())),
                              preferred_element_type=jnp.float32)   # (H*N, M)

        # Max-subtracted softmax in f32 (matches the PyTorch module exactly).
        sim = sim - jnp.max(sim, axis=-1, keepdims=True)
        p = jnp.exp(sim)
        p = p * pl.reciprocal(jnp.sum(p, axis=-1, keepdims=True), approx=True)

        att = jnp.dot(p.astype(jnp.bfloat16), v_b,
                      preferred_element_type=jnp.float32)           # (H*N, dh)

        # (H*N, dh) -> (N, H*dh)   (matches 'b h n d -> b n (h d)')
        out_rows.append(jnp.concatenate(
            [att[h * n_seq:(h + 1) * n_seq, :] for h in range(heads)], axis=1))

    out_cat = jnp.concatenate(out_rows, axis=0).astype(jnp.bfloat16)  # (bps*N, H*dh)
    out = jnp.dot(out_cat, wo_ref[...], preferred_element_type=jnp.float32)
    o_ref[...] = out.astype(o_ref.dtype)                              # (bps*N, D)


def prepare_params(gamma, wq, wkv, wo, *, dim_head):
    """One-time, exact parameter transform (call once at model init).

    - LayerNorm gamma only feeds the q projection in this module -> fold it.
    - Fold the 1/sqrt(dim_head) attention scale into the same weight.
    - Column-stack [Wq_eff | Wkv] so the kernel does a single fused projection
      (requires dim == context_dim, as in this config).
    - Cast to bf16 so the MXU runs at bf16 rate (f32 accumulation happens
      inside the kernel via preferred_element_type).
    """
    assert wq.shape[0] == wkv.shape[0], (
        "fused q/kv projection requires dim == context_dim")
    scale = dim_head ** (-0.5)
    wq_eff = gamma[:, None] * wq * scale                   # (D, H*dh)
    wqkv = jnp.concatenate([wq_eff, wkv], axis=1).astype(jnp.bfloat16)
    return wqkv, wo.astype(jnp.bfloat16)


@functools.partial(jax.jit,
                   static_argnames=("heads", "dim_head", "batches_per_step"))
def cross_attention(x, context, wqkv, wo, *, heads, dim_head,
                    batches_per_step=None):
    """x: (B, N, D) f32; context: (B, M, Dc) f32. Returns (B, N, D) f32.

    batches_per_step=None  -> single grid step (best on single-TC v5e/v6e).
    batches_per_step=B//2  -> 2-step grid for the dual-TC v7x TensorCore split.
    """
    B, N, D = x.shape
    _, M, Dc = context.shape
    inner = heads * dim_head
    bps = B if batches_per_step is None else batches_per_step
    assert B % bps == 0
    steps = B // bps

    # Layout-free flatten (N, M are multiples of the f32 sublane tile here).
    x2 = x.reshape(B * N, D)
    c2 = context.reshape(B * M, Dc)

    kernel = functools.partial(_cross_attn_kernel, heads=heads,
                               dim_head=dim_head, n_seq=N, m_seq=M,
                               batches=bps)

    flops = 2 * (B * (N + M) * D * (inner + 2 * dim_head)   # fused q/kv proj
                 + 2 * heads * B * N * M * dim_head          # qk^T and pv
                 + B * N * inner * D)                        # output proj
    transcendentals = B * (heads * N * M + N + heads * N)    # exp, rsqrt, recip
    bytes_accessed = ((x.size + context.size + B * N * D) * 4
                      + (wqkv.size + wo.size) * 2)

    out2 = pl.pallas_call(
        kernel,
        out_shape=jax.ShapeDtypeStruct((B * N, D), x.dtype),
        grid_spec=pltpu.PrefetchScalarGridSpec(
            num_scalar_prefetch=0,
            grid=(steps,),
            in_specs=[
                pl.BlockSpec((bps * N, D), lambda s: (s, 0)),          # x
                pl.BlockSpec((bps * M, Dc), lambda s: (s, 0)),         # context
                pl.BlockSpec((D, inner + 2 * dim_head), lambda s: (0, 0)),  # Wqkv
                pl.BlockSpec((inner, D), lambda s: (0, 0)),            # Wo
            ],
            out_specs=pl.BlockSpec((bps * N, D), lambda s: (s, 0)),
        ),
        compiler_params=pltpu.CompilerParams(
            # steps>1 (v7x TC split): "parallel" shards steps across cores;
            # if xprof shows both steps on one TC, switch this axis to
            # pltpu.CORE_PARALLEL.  With steps==1 the semantics are moot.
            dimension_semantics=("arbitrary",) if steps == 1
            else ("parallel",)),
        cost_estimate=pl.CostEstimate(
            flops=flops,
            transcendentals=transcendentals,
            bytes_accessed=bytes_accessed),
    )(x2, c2, wqkv, wo)
    return out2.reshape(B, N, D)


def _reference(x, context, gamma, wq, wkv, wo, *, heads, dim_head):
    # pure-JAX f32 reference mirroring the PyTorch forward
    scale = dim_head ** (-0.5)
    mean = jnp.mean(x, axis=-1, keepdims=True)
    xc = x - mean
    var = jnp.mean(xc * xc, axis=-1, keepdims=True)
    xn = xc / jnp.sqrt(var + 1e-5) * gamma
    q = xn @ wq                                            # (B,N,H*dh)
    B, N, _ = q.shape
    q = q.reshape(B, N, heads, dim_head).transpose(0, 2, 1, 3) * scale
    kv = context @ wkv
    k, v = kv[..., :dim_head], kv[..., dim_head:]
    sim = jnp.einsum('bhid,bjd->bhij', q, k)
    sim = sim - jnp.max(sim, axis=-1, keepdims=True)
    attn = jax.nn.softmax(sim, axis=-1)
    out = jnp.einsum('bhij,bjd->bhid', attn, v)
    out = out.transpose(0, 2, 1, 3).reshape(B, N, heads * dim_head)
    return out @ wo


if __name__ == "__main__":
    # small config: dim=32, context_dim=32, heads=4, dim_head=16
    B, N, M = 2, 8, 8
    DIM, CDIM, HEADS, DIM_HEAD = 32, 32, 4, 16
    INNER = HEADS * DIM_HEAD

    key = jax.random.PRNGKey(0)
    kx, kc, kg, kq, kkv, ko = jax.random.split(key, 6)

    x = jax.random.normal(kx, (B, N, DIM), dtype=jnp.float32)
    context = jax.random.normal(kc, (B, M, CDIM), dtype=jnp.float32)

    # deterministic parameters (nn.Linear without bias -> weight matrices,
    # stored transposed so the kernel does x @ W directly). gamma is perturbed
    # away from 1 so the host-side gamma fold is actually exercised.
    gamma = 1.0 + 0.1 * jax.random.normal(kg, (DIM,), dtype=jnp.float32)
    wq = jax.random.normal(kq, (DIM, INNER), dtype=jnp.float32) * 0.05
    wkv = jax.random.normal(kkv, (CDIM, 2 * DIM_HEAD), dtype=jnp.float32) * 0.05
    wo = jax.random.normal(ko, (INNER, DIM), dtype=jnp.float32) * 0.05
    # TODO(synk): parallel_ff branch (SwiGLU FF) and norm_context LayerNorm are
    # disabled in this config (parallel_ff=False, norm_context=False), so they
    # are intentionally not implemented.

    # One-time parameter prep, hoisted out of the per-call path.
    wqkv_bf, wo_bf = prepare_params(gamma, wq, wkv, wo, dim_head=DIM_HEAD)
    wqkv_bf, wo_bf = jax.block_until_ready((wqkv_bf, wo_bf))

    out = cross_attention(x, context, wqkv_bf, wo_bf,
                          heads=HEADS, dim_head=DIM_HEAD)
    out = jax.block_until_ready(out)

    ref = _reference(x, context, gamma, wq, wkv, wo,
                     heads=HEADS, dim_head=DIM_HEAD)
    # bf16 MXU operands (f32 accumulate) + approx reciprocal -> loosened
    # tolerance vs the f32 reference.
    assert jnp.allclose(out, ref, atol=2e-2, rtol=2e-2), \
        f"max err {jnp.max(jnp.abs(out - ref))}"

    print("KERNEL_OK")
</pallas_src>

<mosaic_0001>
module attributes {stable_mosaic.version = 11 : i64} {
  func.func @_cross_attn_kernel(%arg0: i32, %arg1: memref<16x32xf32, #tpu.memory_space<vmem>>, %arg2: memref<16x32xf32, #tpu.memory_space<vmem>>, %arg3: memref<32x96xbf16, #tpu.memory_space<vmem>>, %arg4: memref<64x32xbf16, #tpu.memory_space<vmem>>, %arg5: memref<16x32xf32, #tpu.memory_space<vmem>>) attributes {dimension_semantics = [#tpu.dimension_semantics<arbitrary>], iteration_bounds = array<i64: 1>, scalar_prefetch = 0 : i64, scratch_operands = 0 : i64, tpu.core_type = #tpu.core_type<tc>, window_params = [{transform_indices = @transform_0, window_bounds = array<i64: 16, 32>}, {transform_indices = @transform_1, window_bounds = array<i64: 16, 32>}, {pipeline_mode = #tpu.pipeline_mode<synchronous>, transform_indices = @transform_2, window_bounds = array<i64: 32, 96>}, {pipeline_mode = #tpu.pipeline_mode<synchronous>, transform_indices = @transform_3, window_bounds = array<i64: 64, 32>}, {transform_indices = @transform_4, window_bounds = array<i64: 16, 32>}]} {
    %c0 = arith.constant 0 : index
    %c0_0 = arith.constant 0 : index
    %0 = vector.load %arg1[%c0, %c0_0] : memref<16x32xf32, #tpu.memory_space<vmem>>, vector<16x32xf32>
    %c0_1 = arith.constant 0 : index
    %c0_2 = arith.constant 0 : index
    %1 = vector.load %arg2[%c0_1, %c0_2] : memref<16x32xf32, #tpu.memory_space<vmem>>, vector<16x32xf32>
    %cst = arith.constant dense<0.000000e+00> : vector<16xf32>
    %2 = vector.multi_reduction <add>, %0, %cst [1] : vector<16x32xf32> to vector<16xf32>
    %3 = vector.shape_cast %2 : vector<16xf32> to vector<16x1xf32>
    %cst_3 = arith.constant 3.200000e+01 : f32
    %4 = vector.broadcast %cst_3 : f32 to vector<16x1xf32>
    %5 = arith.divf %3, %4 : vector<16x1xf32>
    %6 = arith.mulf %0, %0 : vector<16x32xf32>
    %cst_4 = arith.constant dense<0.000000e+00> : vector<16xf32>
    %7 = vector.multi_reduction <add>, %6, %cst_4 [1] : vector<16x32xf32> to vector<16xf32>
    %8 = vector.shape_cast %7 : vector<16xf32> to vector<16x1xf32>
    %cst_5 = arith.constant 3.200000e+01 : f32
    %9 = vector.broadcast %cst_5 : f32 to vector<16x1xf32>
    %10 = arith.divf %8, %9 : vector<16x1xf32>
    %11 = arith.mulf %5, %5 : vector<16x1xf32>
    %12 = arith.subf %10, %11 : vector<16x1xf32>
    %13 = vector.broadcast %5 : vector<16x1xf32> to vector<16x32xf32>
    %14 = arith.subf %0, %13 : vector<16x32xf32>
    %cst_6 = arith.constant 9.99999974E-6 : f32
    %15 = vector.broadcast %cst_6 : f32 to vector<16x1xf32>
    %16 = arith.addf %12, %15 : vector<16x1xf32>
    %17 = math.rsqrt %16 : vector<16x1xf32>
    %18 = vector.broadcast %17 : vector<16x1xf32> to vector<16x32xf32>
    %19 = arith.mulf %14, %18 : vector<16x32xf32>
    %20 = arith.truncf %19 : vector<16x32xf32> to vector<16x32xbf16>
    %21 = arith.truncf %1 : vector<16x32xf32> to vector<16x32xbf16>
    %22 = tpu.concatenate %20, %21 in 0 : vector<16x32xbf16>, vector<16x32xbf16> -> vector<32x32xbf16>
    %c0_7 = arith.constant 0 : index
    %c0_8 = arith.constant 0 : index
    %23 = vector.load %arg3[%c0_7, %c0_8] : memref<32x96xbf16, #tpu.memory_space<vmem>>, vector<32x96xbf16>
    %cst_9 = arith.constant dense<0.000000e+00> : vector<32x96xf32>
    %24 = tpu.matmul %22, %23, %cst_9 {dimension_numbers = #tpu.dot_dimension_numbers<[1], [0], [0], [1], [0, 0, 1, 1], [], []>} : vector<32x32xbf16>, vector<32x96xbf16>, vector<32x96xf32> -> vector<32x96xf32>
    %25 = vector.extract_strided_slice %24 {offsets = [0, 0], sizes = [16, 64], strides = [1, 1]} : vector<32x96xf32> to vector<16x64xf32>
    %26 = vector.extract_strided_slice %24 {offsets = [16, 64], sizes = [16, 32], strides = [1, 1]} : vector<32x96xf32> to vector<16x32xf32>
    %27 = vector.extract_strided_slice %25 {offsets = [0, 0], sizes = [8, 16], strides = [1, 1]} : vector<16x64xf32> to vector<8x16xf32>
    %28 = vector.extract_strided_slice %25 {offsets = [0, 16], sizes = [8, 16], strides = [1, 1]} : vector<16x64xf32> to vector<8x16xf32>
    %29 = vector.extract_strided_slice %25 {offsets = [0, 32], sizes = [8, 16], strides = [1, 1]} : vector<16x64xf32> to vector<8x16xf32>
    %30 = vector.extract_strided_slice %25 {offsets = [0, 48], sizes = [8, 16], strides = [1, 1]} : vector<16x64xf32> to vector<8x16xf32>
    %31 = tpu.concatenate %27, %28, %29, %30 in 0 : vector<8x16xf32>, vector<8x16xf32>, vector<8x16xf32>, vector<8x16xf32> -> vector<32x16xf32>
    %32 = arith.truncf %31 : vector<32x16xf32> to vector<32x16xbf16>
    %33 = vector.extract_strided_slice %26 {offsets = [0, 0], sizes = [8, 16], strides = [1, 1]} : vector<16x32xf32> to vector<8x16xf32>
    %34 = arith.truncf %33 : vector<8x16xf32> to vector<8x16xbf16>
    %35 = vector.extract_strided_slice %26 {offsets = [0, 16], sizes = [8, 16], strides = [1, 1]} : vector<16x32xf32> to vector<8x16xf32>
    %36 = arith.truncf %35 : vector<8x16xf32> to vector<8x16xbf16>
    %cst_10 = arith.constant dense<0.000000e+00> : vector<32x8xf32>
    %37 = tpu.matmul %32, %34, %cst_10 {dimension_numbers = #tpu.dot_dimension_numbers<[1], [1], [0], [0], [0, 0, 1, 0], [], []>} : vector<32x16xbf16>, vector<8x16xbf16>, vector<32x8xf32> -> vector<32x8xf32>
    %cst_11 = arith.constant dense<0xFF800000> : vector<32xf32>
    %38 = vector.multi_reduction <maximumf>, %37, %cst_11 [1] : vector<32x8xf32> to vector<32xf32>
    %39 = vector.shape_cast %38 : vector<32xf32> to vector<32x1xf32>
    %40 = vector.broadcast %39 : vector<32x1xf32> to vector<32x8xf32>
    %41 = arith.subf %37, %40 : vector<32x8xf32>
    %42 = math.exp %41 : vector<32x8xf32>
    %cst_12 = arith.constant dense<0.000000e+00> : vector<32xf32>
    %43 = vector.multi_reduction <add>, %42, %cst_12 [1] : vector<32x8xf32> to vector<32xf32>
    %44 = vector.shape_cast %43 : vector<32xf32> to vector<32x1xf32>
    %45 = tpu.reciprocal %44 {approx = true} : vector<32x1xf32> -> vector<32x1xf32>
    %46 = vector.broadcast %45 : vector<32x1xf32> to vector<32x8xf32>
    %47 = arith.mulf %42, %46 : vector<32x8xf32>
    %48 = arith.truncf %47 : vector<32x8xf32> to vector<32x8xbf16>
    %cst_13 = arith.constant dense<0.000000e+00> : vector<32x16xf32>
    %49 = tpu.matmul %48, %36, %cst_13 {dimension_numbers = #tpu.dot_dimension_numbers<[1], [0], [0], [1], [0, 0, 1, 1], [], []>} : vector<32x8xbf16>, vector<8x16xbf16>, vector<32x16xf32> -> vector<32x16xf32>
    %50 = vector.extract_strided_slice %49 {offsets = [0, 0], sizes = [8, 16], strides = [1, 1]} : vector<32x16xf32> to vector<8x16xf32>
    %51 = vector.extract_strided_slice %49 {offsets = [8, 0], sizes = [8, 16], strides = [1, 1]} : vector<32x16xf32> to vector<8x16xf32>
    %52 = vector.extract_strided_slice %49 {offsets = [16, 0], sizes = [8, 16], strides = [1, 1]} : vector<32x16xf32> to vector<8x16xf32>
    %53 = vector.extract_strided_slice %49 {offsets = [24, 0], sizes = [8, 16], strides = [1, 1]} : vector<32x16xf32> to vector<8x16xf32>
    %54 = tpu.concatenate %50, %51, %52, %53 in 1 : vector<8x16xf32>, vector<8x16xf32>, vector<8x16xf32>, vector<8x16xf32> -> vector<8x64xf32>
    %55 = vector.extract_strided_slice %25 {offsets = [8, 0], sizes = [8, 16], strides = [1, 1]} : vector<16x64xf32> to vector<8x16xf32>
    %56 = vector.extract_strided_slice %25 {offsets = [8, 16], sizes = [8, 16], strides = [1, 1]} : vector<16x64xf32> to vector<8x16xf32>
    %57 = vector.extract_strided_slice %25 {offsets = [8, 32], sizes = [8, 16], strides = [1, 1]} : vector<16x64xf32> to vector<8x16xf32>
    %58 = vector.extract_strided_slice %25 {offsets = [8, 48], sizes = [8, 16], strides = [1, 1]} : vector<16x64xf32> to vector<8x16xf32>
    %59 = tpu.concatenate %55, %56, %57, %58 in 0 : vector<8x16xf32>, vector<8x16xf32>, vector<8x16xf32>, vector<8x16xf32> -> vector<32x16xf32>
    %60 = arith.truncf %59 : vector<32x16xf32> to vector<32x16xbf16>
    %61 = vector.extract_strided_slice %26 {offsets = [8, 0], sizes = [8, 16], strides = [1, 1]} : vector<16x32xf32> to vector<8x16xf32>
    %62 = arith.truncf %61 : vector<8x16xf32> to vector<8x16xbf16>
    %63 = vector.extract_strided_slice %26 {offsets = [8, 16], sizes = [8, 16], strides = [1, 1]} : vector<16x32xf32> to vector<8x16xf32>
    %64 = arith.truncf %63 : vector<8x16xf32> to vector<8x16xbf16>
    %cst_14 = arith.constant dense<0.000000e+00> : vector<32x8xf32>
    %65 = tpu.matmul %60, %62, %cst_14 {dimension_numbers = #tpu.dot_dimension_numbers<[1], [1], [0], [0], [0, 0, 1, 0], [], []>} : vector<32x16xbf16>, vector<8x16xbf16>, vector<32x8xf32> -> vector<32x8xf32>
    %cst_15 = arith.constant dense<0xFF800000> : vector<32xf32>
    %66 = vector.multi_reduction <maximumf>, %65, %cst_15 [1] : vector<32x8xf32> to vector<32xf32>
    %67 = vector.shape_cast %66 : vector<32xf32> to vector<32x1xf32>
    %68 = vector.broadcast %67 : vector<32x1xf32> to vector<32x8xf32>
    %69 = arith.subf %65, %68 : vector<32x8xf32>
    %70 = math.exp %69 : vector<32x8xf32>
    %cst_16 = arith.constant dense<0.000000e+00> : vector<32xf32>
    %71 = vector.multi_reduction <add>, %70, %cst_16 [1] : vector<32x8xf32> to vector<32xf32>
    %72 = vector.shape_cast %71 : vector<32xf32> to vector<32x1xf32>
    %73 = tpu.reciprocal %72 {approx = true} : vector<32x1xf32> -> vector<32x1xf32>
    %74 = vector.broadcast %73 : vector<32x1xf32> to vector<32x8xf32>
    %75 = arith.mulf %70, %74 : vector<32x8xf32>
    %76 = arith.truncf %75 : vector<32x8xf32> to vector<32x8xbf16>
    %cst_17 = arith.constant dense<0.000000e+00> : vector<32x16xf32>
    %77 = tpu.matmul %76, %64, %cst_17 {dimension_numbers = #tpu.dot_dimension_numbers<[1], [0], [0], [1], [0, 0, 1, 1], [], []>} : vector<32x8xbf16>, vector<8x16xbf16>, vector<32x16xf32> -> vector<32x16xf32>
    %78 = vector.extract_strided_slice %77 {offsets = [0, 0], sizes = [8, 16], strides = [1, 1]} : vector<32x16xf32> to vector<8x16xf32>
    %79 = vector.extract_strided_slice %77 {offsets = [8, 0], sizes = [8, 16], strides = [1, 1]} : vector<32x16xf32> to vector<8x16xf32>
    %80 = vector.extract_strided_slice %77 {offsets = [16, 0], sizes = [8, 16], strides = [1, 1]} : vector<32x16xf32> to vector<8x16xf32>
    %81 = vector.extract_strided_slice %77 {offsets = [24, 0], sizes = [8, 16], strides = [1, 1]} : vector<32x16xf32> to vector<8x16xf32>
    %82 = tpu.concatenate %78, %79, %80, %81 in 1 : vector<8x16xf32>, vector<8x16xf32>, vector<8x16xf32>, vector<8x16xf32> -> vector<8x64xf32>
    %83 = tpu.concatenate %54, %82 in 0 : vector<8x64xf32>, vector<8x64xf32> -> vector<16x64xf32>
    %84 = arith.truncf %83 : vector<16x64xf32> to vector<16x64xbf16>
    %c0_18 = arith.constant 0 : index
    %c0_19 = arith.constant 0 : index
    %85 = vector.load %arg4[%c0_18, %c0_19] : memref<64x32xbf16, #tpu.memory_space<vmem>>, vector<64x32xbf16>
    %cst_20 = arith.constant dense<0.000000e+00> : vector<16x32xf32>
    %86 = tpu.matmul %84, %85, %cst_20 {dimension_numbers = #tpu.dot_dimension_numbers<[1], [0], [0], [1], [0, 0, 1, 1], [], []>} : vector<16x64xbf16>, vector<64x32xbf16>, vector<16x32xf32> -> vector<16x32xf32>
    %c0_21 = arith.constant 0 : index
    %c0_22 = arith.constant 0 : index
    %87 = vector.load %arg5[%c0_21, %c0_22] : memref<16x32xf32, #tpu.memory_space<vmem>>, vector<16x32xf32>
    tpu.vector_store %arg5[%c0_21, %c0_22], %86 {strides = array<i32>} : memref<16x32xf32, #tpu.memory_space<vmem>>, vector<16x32xf32>,
    return
  }
  func.func @transform_0(%arg0: i32) -> (i32, i32) {
    %c0_i32 = arith.constant 0 : i32
    %c0_i32_0 = arith.constant 0 : i32
    return %arg0, %c0_i32 : i32, i32
  }
  func.func @transform_1(%arg0: i32) -> (i32, i32) {
    %c0_i32 = arith.constant 0 : i32
    %c0_i32_0 = arith.constant 0 : i32
    return %arg0, %c0_i32 : i32, i32
  }
  func.func @transform_2(%arg0: i32) -> (i32, i32) {
    %c0_i32 = arith.constant 0 : i32
    %c0_i32_0 = arith.constant 0 : i32
    %c0_i32_1 = arith.constant 0 : i32
    return %c0_i32, %c0_i32_0 : i32, i32
  }
  func.func @transform_3(%arg0: i32) -> (i32, i32) {
    %c0_i32 = arith.constant 0 : i32
    %c0_i32_0 = arith.constant 0 : i32
    %c0_i32_1 = arith.constant 0 : i32
    return %c0_i32, %c0_i32_0 : i32, i32
  }
  func.func @transform_4(%arg0: i32) -> (i32, i32) {
    %c0_i32 = arith.constant 0 : i32
    %c0_i32_0 = arith.constant 0 : i32
    return %arg0, %c0_i32 : i32, i32
  }
}

</mosaic_0001>

<bundles_post_ra>
// kernel: cross_attention.1
= control target key start
LH: loop header
LB: loop body
LE: loop exit
PB: predicated region body
PF: predicated region fallthrough
CT: control target
= control target key end

     0   :  { %vm23_vm0 = vcmask 261120   ;;  %s931_s0 = inlined_call_operand.vmem [shape: f32[16,32], index: 0, kind: input, shape index: {}]   ;;  %s932_s1 = inlined_call_operand.vmem [shape: f32[16,32], index: 1, kind: input, shape index: {}]   ;;  %s933_s2 = inlined_call_operand.vmem [shape: bf16[32,96], index: 2, kind: input, shape index: {}]   ;;  %s934_s3 = inlined_call_operand.vmem [shape: bf16[64,32], index: 3, kind: input, shape index: {}]   ;;  %s935_s4 = inlined_call_operand.hbm [shape: f32[16,32], index: 4, kind: output, shape index: {}]  }
   0x1   :  { %v19_v0 = vld [vmem:[%s931_s0] sm:$0xff]  ;;  %v20_v1 = vld [vmem:[%s931_s0 + $0x8] sm:$0xff] }
   0x2   :  { %v24_v2 = vsel %vm23_vm0, %v19_v0, 0.0  ;;  %v33_v3 = vmul.f32 %v19_v0, %v19_v0  ;;  %v34_v4 = vmul.f32 %v20_v1, %v20_v1  ;;  %v27_v6 = vsel %vm23_vm0, %v20_v1, 0.0 }
   0x3   :  { %25 = vadd.xlane.f32.xlu0 %v24_v2 }
   0x4   :  { %v35_v5 = vsel %vm23_vm0, %v33_v3, 0.0  ;;  %v38_v7 = vsel %vm23_vm0, %v34_v4, 0.0 }
   0x5   :  { %36 = vadd.xlane.f32.xlu1 %v35_v5 }
   0x6   :  { %9 = vsyncpa [#allocation3], 0  ;;  %v731_v8 = vld [vmem:[%s933_s2] sm:$0xff]   ;;  %v732_v9 = vld [vmem:[%s933_s2 + $0x8] sm:$0xff]   ;;  %s797_s25 = smov 112   ;;  %s798_s26 = smov 64  }
   0x7   :  { %28 = vadd.xlane.f32.xlu0 %v27_v6  ;;  %656 = vmatprep.subr.bf16.mxu0 %v731_v8  ;;  %v21_v27 = vld [vmem:[%s932_s1] sm:$0xff]  ;;  %v22_v28 = vld [vmem:[%s932_s1 + $0x8] sm:$0xff]  ;;  %s799_s1 = smov 96   ;;  %s800_s27 = smov 80   ;;  %vm144_vm1 = vcmask 130048   ;;  %vm203_vm2 = vcmask 64512  }
   0x8   :  { %657 = vmatpush3.bf16.msra.mxu0 %v731_v8  ;;  %v56_v32 = vpack.c.bf16 %v22_v28, %v21_v27  ;;  %s801_s28 = smov 48   ;;  %vm258_vm3 = vcmask 1043456   ;;  %vm803_vm4 = vmmov 0   ;;  %s804_s11 = smov 16   ;;  %vm325_vm5 = vcmask 392192  }
   0x9   :  { %39 = vadd.xlane.f32.xlu1 %v38_v7  ;;  %658 = vmatprep.subr.bf16.mxu0 %v732_v9  ;;  %s805_s12 = smov 32   ;;  %vm555_vm6 = vcmask 523264  }
   0xc   :  { %659 = vmatpush3.bf16.msra.mxu0 %v732_v9 }
  0x90   :  { %v26_v10 = vpop.xlane.xlu0 %25 }
  0x91   :  { %v31_v11 = vmul.f32 0.03125, %v26_v10 }
  0x92   :  { %v37_v12 = vpop.xlane.xlu1 %36 }
  0x93   :  { %v43_v13 = vmul.f32 %v31_v11, %v31_v11  ;;  %v41_v14 = vmul.f32 0.03125, %v37_v12  ;;  %v47_v25 = vsub.f32 %v19_v0, %v31_v11 }
  0x94   :  { %v29_v15 = vpop.xlane.xlu0 %28 }
  0x95   :  { %v45_v16 = vsub.f32 %v41_v14, %v43_v13  ;;  %v32_v17 = vmul.f32 0.03125, %v29_v15 }
  0x96   :  { %v40_v18 = vpop.xlane.xlu1 %39 }
  0x97   :  { %v49_v19 = vadd.f32 1e-05, %v45_v16  ;;  %v44_v20 = vmul.f32 %v32_v17, %v32_v17  ;;  %v42_v21 = vmul.f32 0.03125, %v40_v18  ;;  %v48_v26 = vsub.f32 %v20_v1, %v32_v17 }
  0x99   :  { %v46_v22 = vsub.f32 %v42_v21, %v44_v20  ;;  %737 = vrsqrt.f32 %v49_v19 }
  0x9b   :  { %v50_v23 = vadd.f32 1e-05, %v46_v22 }
  0x9d   :  { %739 = vrsqrt.f32 %v50_v23 }
  0xa3   :  { %v738_v24 = vpop.eup %737 }
  0xa4   :  { %v53_v30 = vmul.f32 %v738_v24, %v47_v25 }
  0xa7   :  { %v740_v29 = vpop.eup %739 }
  0xa8   :  { %v54_v31 = vmul.f32 %v740_v29, %v48_v26 }
  0xaa   :  { %v55_v33 = vpack.c.bf16 %v54_v31, %v53_v30 }
  0xac   :  { %660 = vmatprep.mubr.msk.bf16.mxu0 %vm23_vm0, %v55_v33 }
  0xad   :  { %661 = vmatmul.mubr.msk.bf16.vlgmr.msra.gmra.mrb[0].mxu0 %vm23_vm0, %v56_v32 }
 0x180   :  { %v662_v34 = vpop.f32.mrb[0].mxu0 }
 0x181   :  { %v858_v35 = vpack.c.bf16 %v662_v34, %v662_v34  ;;  %v113_v36 = vpop.f32.mrb[1].mxu0 }
 0x182   :  { %129 = vrot.lane.b32.xlu1 %v113_v36, %s797_s25  ;;  %v663_v37 = vpop.f32.mrb[2].mxu0 }
 0x183   :  { %142 = vrot.lane.b32.xlu0 %v858_v35, %s798_s26  ;;  %v116_v38 = vpop.f32.mrb[3].mxu0  ;;  %v861_v39 = vpack.c.bf16 %v663_v37, %v663_v37 }
 0x186   :  { %132 = vrot.lane.b32.xlu1 %v113_v36, %s799_s1 }
 0x187   :  { %341 = vrot.lane.b32.xlu0 %v861_v39, %s798_s26 }
 0x18a   :  { %135 = vrot.lane.b32.xlu1 %v113_v36, %s800_s27 }
 0x18b   :  { %331 = vrot.lane.b32.xlu0 %v116_v38, %s799_s1 }
 0x18e   :  { %328 = vrot.lane.b32.xlu1 %v116_v38, %s797_s25 }
 0x192   :  { %334 = vrot.lane.b32.xlu1 %v116_v38, %s800_s27 }
 0x1f4   :  { %v130_v40 = vpop.permute.xlu1 %129 }
 0x1f5   :  { %v138_v41 = vpack.c.bf16 %v130_v40, %v113_v36  ;;  %v143_v42 = vpop.permute.xlu0 %142 }
 0x1f6   :  { %700 = vmatprep.subr.msk.bf16.mxu1 %vm144_vm1, %v143_v42  ;;  %v152_v43 = vsel %vm144_vm1, %v143_v42, 0 }
 0x1f7   :  { %665 = vmatpush3.bf16.xpose.msra.mxu1 %v152_v43  ;;  %666 = vmatprep.mubr.msk.bf16.mxu1 %vm144_vm1, %v138_v41 }
 0x1f8   :  { %v133_v44 = vpop.permute.xlu1 %132 }
 0x1f9   :  { %v342_v45 = vpop.permute.xlu0 %341 }
 0x1fa   :  { %702 = vmatprep.subr.msk.bf16.mxu1 %vm144_vm1, %v342_v45  ;;  %v350_v48 = vsel %vm144_vm1, %v342_v45, 0 }
 0x1fc   :  { %v136_v46 = vpop.permute.xlu1 %135 }
 0x1fd   :  { %v139_v47 = vpack.c.bf16 %v136_v46, %v133_v44  ;;  %v332_v51 = vpop.permute.xlu0 %331 }
 0x1ff   :  { %667 = vmatmul.mubr.msk.bf16.vlgmr.msra.gmra.mrb[0].mxu1 %vm144_vm1, %v139_v47 }
 0x200   :  { %677 = vmatpush3.bf16.xpose.msra.mxu1 %v350_v48  ;;  %v329_v49 = vpop.permute.xlu1 %328 }
 0x201   :  { %v337_v50 = vpack.c.bf16 %v329_v49, %v116_v38 }
 0x203   :  { %678 = vmatprep.mubr.msk.bf16.mxu1 %vm144_vm1, %v337_v50 }
 0x204   :  { %v335_v52 = vpop.permute.xlu1 %334 }
 0x205   :  { %v338_v53 = vpack.c.bf16 %v335_v52, %v332_v51 }
 0x207   :  { %679 = vmatmul.mubr.msk.bf16.vlgmr.msra.gmra.mrb[4].mxu1 %vm144_vm1, %v338_v53 }
 0x2d2   :  { %v668_v54 = vpop.f32.mrb[0].mxu1 }
 0x2d3   :  { %v188_v55 = vpop.f32.mrb[1].mxu1  ;;  %v210_v60 = vsel %vm203_vm2, %v668_v54, -inf }
 0x2d4   :  { %v669_v56 = vpop.f32.mrb[2].mxu1  ;;  %v204_v57 = vsel %vm203_vm2, %v188_v55, -inf }
 0x2d5   :  { %v191_v58 = vpop.f32.mrb[3].mxu1  ;;  %205 = vmax.xlane.f32.xlu0 %v204_v57  ;;  %v213_v0 = vsel %vm203_vm2, %v669_v56, -inf }
 0x2d6   :  { %v207_v59 = vsel %vm203_vm2, %v191_v58, -inf }
 0x2d7   :  { %208 = vmax.xlane.f32.xlu1 %v207_v59 }
 0x2d9   :  { %211 = vmax.xlane.f32.xlu0 %v210_v60 }
 0x2da   :  { %v680_v61 = vpop.f32.mrb[4].mxu1 }
 0x2db   :  { %v386_v62 = vpop.f32.mrb[5].mxu1  ;;  %v407_v5 = vsel %vm203_vm2, %v680_v61, -inf }
 0x2dc   :  { %v681_v63 = vpop.f32.mrb[6].mxu1  ;;  %v401_v3 = vsel %vm203_vm2, %v386_v62, -inf }
 0x2dd   :  { %214 = vmax.xlane.f32.xlu0 %v213_v0  ;;  %v389_v1 = vpop.f32.mrb[7].mxu1  ;;  %v410_v4 = vsel %vm203_vm2, %v681_v63, -inf }
 0x2de   :  { %v404_v2 = vsel %vm203_vm2, %v389_v1, -inf }
 0x2df   :  { %405 = vmax.xlane.f32.xlu1 %v404_v2 }
 0x2e1   :  { %402 = vmax.xlane.f32.xlu0 %v401_v3 }
 0x2e3   :  { %411 = vmax.xlane.f32.xlu1 %v410_v4 }
 0x2e5   :  { %408 = vmax.xlane.f32.xlu0 %v407_v5 }
 0x362   :  { %v206_v6 = vpop.xlane.xlu0 %205 }
 0x363   :  { %v216_v7 = vsub.f32 %v188_v55, %v206_v6 }
 0x364   :  { %v209_v8 = vpop.xlane.xlu1 %208 }
 0x365   :  { %v220_v11 = vmul.f32 1.442695, %v216_v7  ;;  %v217_v12 = vsub.f32 %v191_v58, %v209_v8 }
 0x366   :  { %v212_v9 = vpop.xlane.xlu0 %211 }
 0x367   :  { %v218_v10 = vsub.f32 %v668_v54, %v212_v9  ;;  %v222_v17 = vmul.f32 1.442695, %v217_v12 }
 0x369   :  { %v224_v13 = vmul.f32 1.442695, %v218_v10 }
 0x36a   :  { %v215_v14 = vpop.xlane.xlu0 %214 }
 0x36b   :  { %741 = vpow2.f32 %v224_v13  ;;  %v219_v15 = vsub.f32 %v669_v56, %v215_v14  ;;  %v733_v14 = vld [vmem:[%s934_s3] sm:$0xff]  }
 0x36c   :  { %v406_v16 = vpop.xlane.xlu1 %405  ;;  %743 = vpow2.f32 %v220_v11 }
 0x36d   :  { %v226_v18 = vmul.f32 1.442695, %v219_v15  ;;  %v414_v20 = vsub.f32 %v389_v1, %v406_v16  ;;  %v802_v15 = vmov 0.0   ;;  %v734_v16 = vld [vmem:[%s934_s3 + $0x8] sm:$0xff]  }
 0x36e   :  { %v403_v19 = vpop.xlane.xlu0 %402  ;;  %688 = vmatprep.subr.bf16.mxu1 %v802_v15  ;;  %696 = vmatprep.mubr.msk.bf16.mxu1 %vm803_vm4, %v802_v15 }
 0x36f   :  { %745 = vpow2.f32 %v226_v18  ;;  %v413_v22 = vsub.f32 %v386_v62, %v403_v19  ;;  %v419_v27 = vmul.f32 1.442695, %v414_v20  ;;  %689 = vmatpush3.bf16.msra.mxu1 %v733_v14 }
 0x370   :  { %v412_v21 = vpop.xlane.xlu1 %411  ;;  %747 = vpow2.f32 %v222_v17  ;;  %690 = vmatprep.subr.bf16.mxu1 %v802_v15 }
 0x371   :  { %v416_v23 = vsub.f32 %v681_v63, %v412_v21  ;;  %v417_v29 = vmul.f32 1.442695, %v413_v22  ;;  %v735_v21 = vld [vmem:[%s934_s3 + $0x10] sm:$0xff]   ;;  %v736_v22 = vld [vmem:[%s934_s3 + $0x18] sm:$0xff]   ;;  %s806_s3 = smov [#allocation2]  }
 0x372   :  { %v409_v24 = vpop.xlane.xlu0 %408  ;;  %s607_s13 = sshll.u32 %s806_s3, 4  ;;  %s608_s13 = int_to_ptr.vmem [resolvable:$true] %s607_s13 }
 0x373   :  { %v423_v25 = vmul.f32 1.442695, %v416_v23  ;;  %v415_v26 = vsub.f32 %v680_v61, %v409_v24  ;;  %691 = vmatpush3.bf16.msra.mxu1 %v734_v16  ;;  %s773_s14 = scalar_lea.vmem %s608_s13, 256  ;;  %p778_p1 = scmp.lt.s32.totalorder %s608_s13, %s608_s13 }
 0x374   :  { %692 = vmatprep.subr.bf16.mxu1 %v802_v15  ;;  %p774_p0 = scmp.ne.s32.totalorder %s608_s13, %s773_s14  ;;  %p779_p2 = scmp.lt.s32.totalorder %s773_s14, %s773_s14 }
 0x375   :  { %v742_v28 = vpop.eup %741  ;;  %749 = vpow2.f32 %v423_v25  ;;  %v421_v30 = vmul.f32 1.442695, %v415_v26 }
 0x376   :  { %v234_v31 = vsel %vm203_vm2, %v742_v28, 0.0  ;;  %v744_v32 = vpop.eup %743  ;;  %p780_p3 = por %p779_p2, %p778_p1 }
 0x377   :  { %751 = vpow2.f32 %v421_v30  ;;  %235 = vadd.xlane.f32.xlu0 %v234_v31  ;;  %v228_v34 = vsel %vm203_vm2, %v744_v32, 0.0  ;;  %693 = vmatpush3.bf16.msra.mxu1 %v735_v21 }
 0x378   :  { %753 = vpow2.f32 %v419_v27  ;;  %694 = vmatprep.subr.bf16.mxu1 %v802_v15  ;;  %p781_p4 = pnand %p780_p3, %p774_p0 }
 0x379   :  { %v746_v33 = vpop.eup %745  ;;  %755 = vpow2.f32 %v417_v29 }
 0x37a   :  { %v237_v36 = vsel %vm203_vm2, %v746_v33, 0.0  ;;  %v748_v37 = vpop.eup %747 }
 0x37b   :  { %229 = vadd.xlane.f32.xlu0 %v228_v34  ;;  %238 = vadd.xlane.f32.xlu1 %v237_v36  ;;  %v231_v38 = vsel %vm203_vm2, %v748_v37, 0.0 }
 0x37c   :  { %695 = vmatpush3.bf16.msra.mxu1 %v736_v22 }
 0x37f   :  { %v750_v40 = vpop.eup %749  ;;  %232 = vadd.xlane.f32.xlu1 %v231_v38 }
 0x380   :  { %v434_v44 = vsel %vm203_vm2, %v750_v40, 0.0 }
 0x381   :  { %v752_v41 = vpop.eup %751 }
 0x382   :  { %v754_v42 = vpop.eup %753  ;;  %v431_v43 = vsel %vm203_vm2, %v752_v41, 0.0 }
 0x383   :  { %v756_v45 = vpop.eup %755  ;;  %432 = vadd.xlane.f32.xlu0 %v431_v43  ;;  %435 = vadd.xlane.f32.xlu1 %v434_v44  ;;  %v428_v47 = vsel %vm203_vm2, %v754_v42, 0.0 }
 0x384   :  { %v425_v46 = vsel %vm203_vm2, %v756_v45, 0.0 }
 0x387   :  { %426 = vadd.xlane.f32.xlu0 %v425_v46  ;;  %429 = vadd.xlane.f32.xlu1 %v428_v47 }
 0x398   :  { %447 = vrot.lane.b32.xlu1 %v861_v39, %s801_s28 }
 0x39d   :  { %250 = vrot.lane.b32.xlu0 %v858_v35, %s801_s28 }
 0x404   :  { %v236_v48 = vpop.xlane.xlu0 %235 }
 0x408   :  { %v230_v49 = vpop.xlane.xlu0 %229  ;;  %v239_v50 = vpop.xlane.xlu1 %238 }
 0x409   :  { %757 = vrcp.f32 %v239_v50 }
 0x40a   :  { %759 = vrcp.f32 %v230_v49 }
 0x40b   :  { %761 = vrcp.f32 %v236_v48 }
 0x40c   :  { %v233_v51 = vpop.xlane.xlu1 %232 }
 0x40d   :  { %763 = vrcp.f32 %v233_v51 }
 0x410   :  { %v433_v52 = vpop.xlane.xlu0 %432  ;;  %v436_v53 = vpop.xlane.xlu1 %435 }
 0x411   :  { %765 = vrcp.f32 %v433_v52 }
 0x412   :  { %767 = vrcp.f32 %v436_v53 }
 0x413   :  { %v758_v54 = vpop.eup %757 }
 0x414   :  { %v427_v55 = vpop.xlane.xlu0 %426  ;;  %v430_v56 = vpop.xlane.xlu1 %429  ;;  %v247_v58 = vmul.f32 %v758_v54, %v746_v33 }
 0x415   :  { %v760_v57 = vpop.eup %759  ;;  %769 = vrcp.f32 %v427_v55 }
 0x416   :  { %v762_v39 = vpop.eup %761  ;;  %771 = vrcp.f32 %v430_v56  ;;  %v244_v60 = vmul.f32 %v760_v57, %v744_v32 }
 0x417   :  { %v764_v35 = vpop.eup %763  ;;  %v246_v62 = vmul.f32 %v762_v39, %v742_v28 }
 0x418   :  { %v251_v59 = vpop.permute.xlu0 %250  ;;  %v245_v61 = vmul.f32 %v764_v35, %v748_v37  ;;  %v448_v0 = vpop.permute.xlu1 %447 }
 0x419   :  { %v260_v63 = vsel %vm258_vm3, %v251_v59, 0  ;;  %701 = vmatprep.subr.msk.bf16.mxu0 %vm258_vm3, %v251_v59  ;;  %v249_v2 = vpack.c.bf16 %v247_v58, %v246_v62  ;;  %v456_v5 = vsel %vm258_vm3, %v448_v0, 0 }
 0x41a   :  { %671 = vmatpush3.bf16.msra.mxu0 %v260_v63  ;;  %v248_v1 = vpack.c.bf16 %v245_v61, %v244_v60 }
 0x41b   :  { %703 = vmatprep.subr.msk.bf16.mxu0 %vm258_vm3, %v448_v0  ;;  %v766_v3 = vpop.eup %765 }
 0x41c   :  { %672 = vmatprep.mubr.msk.bf16.mxu0 %vm203_vm2, %v248_v1  ;;  %v768_v4 = vpop.eup %767  ;;  %v443_v8 = vmul.f32 %v766_v3, %v752_v41 }
 0x41d   :  { %673 = vmatmul.mubr.msk.bf16.vlgmr.msra.gmra.mrb[4].mxu0 %vm203_vm2, %v249_v2  ;;  %v444_v9 = vmul.f32 %v768_v4, %v750_v40 }
 0x41e   :  { %683 = vmatpush3.bf16.msra.mxu0 %v456_v5 }
 0x41f   :  { %v770_v6 = vpop.eup %769  ;;  %v446_v13 = vpack.c.bf16 %v444_v9, %v443_v8 }
 0x420   :  { %v772_v7 = vpop.eup %771  ;;  %v441_v10 = vmul.f32 %v770_v6, %v756_v45 }
 0x421   :  { %v442_v11 = vmul.f32 %v772_v7, %v754_v42 }
 0x423   :  { %v445_v12 = vpack.c.bf16 %v442_v11, %v441_v10 }
 0x425   :  { %684 = vmatprep.mubr.msk.bf16.mxu0 %vm203_vm2, %v445_v12 }
 0x426   :  { %685 = vmatmul.mubr.msk.bf16.vlgmr.msra.gmra.mrb[8].mxu0 %vm203_vm2, %v446_v13 }
 0x4f0   :  { %v674_v17 = vpop.f32.mrb[4].mxu0 }
 0x4f1   :  { %v296_v18 = vpop.f32.mrb[5].mxu0 }
 0x4f2   :  { %v675_v19 = vpop.f32.mrb[6].mxu0 }
 0x4f3   :  { %v299_v20 = vpop.f32.mrb[7].mxu0 }
 0x4f9   :  { %v686_v23 = vpop.f32.mrb[8].mxu0 }
 0x4fa   :  { %v721_v24 = vpack.i.bf16 %v686_v23, %v674_v17  ;;  %v492_v25 = vpop.f32.mrb[9].mxu0 }
 0x4fb   :  { %v687_v26 = vpop.f32.mrb[10].mxu0 }
 0x4fc   :  { %v726_v27 = vpack.i.bf16 %v687_v26, %v675_v19  ;;  %v495_v28 = vpop.f32.mrb[11].mxu0 }
 0x4fd   :  { %v716_v29 = vpack.i.bf16 %v495_v28, %v299_v20 }
 0x4fe   :  { %727 = vrot.lane.b32.xlu0 %v726_v27, %s801_s28 }
 0x4ff   :  { %717 = vrot.lane.b32.xlu1 %v716_v29, %s804_s11 }
 0x503   :  { %722 = vrot.lane.b32.xlu1 %v721_v24, %s805_s12 }
 0x570   :  { %v728_v33 = vpop.permute.xlu0 %727 }
 0x571   :  { %v718_v30 = vpop.permute.xlu1 %717  ;;  %v730_v38 = vunpack.i.h.bf16 %v728_v33  ;;  %v729_v40 = vunpack.i.l.bf16 %v728_v33 }
 0x572   :  { %v720_v31 = vunpack.i.h.bf16 %v718_v30  ;;  %v719_v32 = vunpack.i.l.bf16 %v718_v30 }
 0x574   :  { %v519_v41 = vsel %vm144_vm1, %v492_v25, %v720_v31  ;;  %v323_v42 = vsel %vm144_vm1, %v296_v18, %v719_v32 }
 0x575   :  { %v723_v34 = vpop.permute.xlu1 %722 }
 0x576   :  { %v725_v36 = vunpack.i.h.bf16 %v723_v34  ;;  %v724_v37 = vunpack.i.l.bf16 %v723_v34 }
 0x578   :  { %v324_v43 = vsel %vm23_vm0, %v323_v42, %v724_v37  ;;  %v520_v44 = vsel %vm23_vm0, %v519_v41, %v725_v36 }
 0x579   :  { %v326_v45 = vsel %vm325_vm5, %v324_v43, %v729_v40  ;;  %v521_v46 = vsel %vm325_vm5, %v520_v44, %v730_v38 }
 0x57a   :  { %v522_v47 = vpack.c.bf16 %v521_v46, %v326_v45 }
 0x57c   :  { %697 = vmatmul.mubr.msk.bf16.vlgmr.msra.gmra.mrb[8].mxu1 %vm555_vm6, %v522_v47 }
 0x64f   :  { %v593_v48 = vpop.f32.mrb[8].mxu1 }
 0x650   :  { %600 = vst.msk [vmem:[#allocation2] sm:$0xff] %vm23_vm0, %v593_v48  ;;  %v698_v49 = vpop.f32.mrb[9].mxu1 }
 0x651   :  { %v596_v50 = vpop.f32.mrb[10].mxu1 }
 0x652   :  { %601 = vst.msk [vmem:[#allocation2 + $0x8] sm:$0xff] %vm23_vm0, %v596_v50  ;;  %v699_v51 = vpop.f32.mrb[11].mxu1 }
 0x653   :  { %784 = shalt.err (!%p781_p4)
}
 0x654   :  { %s785_s17 = scalar_lea.hbm %s935_s4, 256 }
 0x655   :  { %p786_p5 = scmp.ne.s32.totalorder %s935_s4, %s785_s17  ;;  %p789_p6 = scmp.lt.u32.totalorder %s785_s17, %s935_s4 }
 0x657   :  { %p791_p7 = pnand %p789_p6, %p786_p5 }
 0x659   :  { %794 = shalt.err (!%p791_p7)
}
 0x65a   :  { %s807_s21 = smov 128   ;;  %s808_s2 = smov 8  }
 0x65b   :  { %613 = dma.vmem_to_hbm [thread:$0]  %s608_s13, 256, %s935_s4, [#allocation3], %s807_s21, %s807_s21, %s808_s2  }
 0x65c   :  { %795 = dma.done.wait [#allocation3], 256  }
 0x65d   :  { %796 = vsyncadd [#allocation3], 4294967040 }
 0x65e   :  { %617 = vsyncpa [#allocation3], 1 }

</bundles_post_ra>
